<compile_context>
chip_gen: v7x
topology: tpu7x:2x2x1
jax: 0.10.0
libtpu: 0.0.40
codegen_flags: <defaults>
</compile_context>

<pallas_src>
import jax
import jax.numpy as jnp
from jax.experimental import pallas as pl
from jax.experimental.pallas import tpu as pltpu


def vertex_conv(region_feats, wkk, bkk, wk1, bk1, *, tn=None,
                vmem_budget=40 * 1024 * 1024):
    """region_feats: (N,k,D); wkk: (k,k,D); bkk: (k,k); wk1: (1,k); bk1: (1,1)."""
    N, k, D = region_feats.shape
    kk = k * k
    W = k * D
    Wp = ((W + 127) // 128) * 128            # pad only the flattened width
    in_dtype = region_feats.dtype
    out_dtype = region_feats.dtype
    itemsize = jnp.dtype(in_dtype).itemsize
    f32 = jnp.float32

    # ---------------- host-side packing + tiny constant matrices ----------------
    r2d = region_feats.reshape(N, W)                       # lane-dense slab
    if Wp != W:
        r2d = jnp.pad(r2d, ((0, 0), (0, Wp - W)))

    # Block-diagonal grouped-conv weight: BD[i*D+d, i*k+j] = wkk[i, j, d].
    eye_k = jnp.eye(k, dtype=f32)
    bd = jnp.einsum("ijd,ic->idcj", wkk.astype(f32), eye_k).reshape(W, kk)
    if Wp != W:
        bd = jnp.pad(bd, ((0, Wp - W), (0, 0)))
    bd = bd.astype(in_dtype)                               # feed MXU in input dtype

    bkk_flat = bkk.reshape(1, kk).astype(f32)              # bias, [i*k+j] order

    # S[i*k+j, i'] = delta(i, i')           -> per-group softmax denominators.
    S = jnp.repeat(jnp.eye(k, dtype=f32), k, axis=0)       # (kk, k)
    # EW[i', i*k+j] = delta(i, i') * wk1[i] -> expand 1/denom back to kk slots
    #                                          with the convK1 weight baked in.
    EW = S.T * wk1.reshape(k, 1).astype(f32)               # (k, kk)
    # GQE[i*k+j, j*D+d] = 1 (d < D)         -> sum over i and broadcast q over d.
    cmod = jnp.arange(kk) % k
    wcol = jnp.arange(Wp)
    valid = wcol < W
    GQE = ((cmod[:, None] == (wcol // D)[None, :]) & valid[None, :]).astype(f32)  # (kk, Wp)
    # F[j*D+d, d'] = delta(d, d') (row < W)  -> fold the k neighbour slots.
    F = (((wcol % D)[:, None] == jnp.arange(D)[None, :]) & valid[:, None]).astype(f32)  # (Wp, D)

    bk1_s = bk1.reshape(1, 1).astype(f32)                  # SMEM scalar

    # ---------------- row-tile sizing ----------------
    def round8(x):
        return max(8, ((x + 7) // 8) * 8)

    if tn is None:
        tn = 512
        tn = min(tn, round8(pl.cdiv(N, 4)))   # >=4 grid steps when N allows (v7x 2 TCs)
    tn = round8(min(tn, round8(N)))

    def footprint(t):
        # double-buffered input + output tiles + ~3 f32 (tn, Wp) in-kernel temps
        return t * (2 * Wp * itemsize + 2 * D * itemsize + 3 * Wp * 4)

    while tn > 8 and footprint(tn) > vmem_budget:
        tn = round8(tn // 2)

    grid_n = pl.cdiv(N, tn)
    Np = grid_n * tn
    if Np != N:
        r2d = jnp.pad(r2d, ((0, Np - N), (0, 0)))

    vmem_limit = int(min(64 * 1024 * 1024, max(16 * 1024 * 1024, 2 * footprint(tn))))

    # ---------------- kernel ----------------
    def kernel(r_ref, bd_ref, bkk_ref, s_ref, ew_ref, gqe_ref, f_ref, bk1_ref, o_ref):
        r = r_ref[...]                                           # (tn, Wp), input dtype
        # Grouped-conv logits for all k groups at once: (tn, k*k).
        logits = jnp.dot(r, bd_ref[...], preferred_element_type=jnp.float32)
        logits = logits + bkk_ref[...]
        # Fused softmax over the k groups: one per-row max (a per-group constant
        # shift, so softmax-invariant; assumes inter-group logit spread << 88 so
        # no group fully underflows), one exp, one exact reciprocal.
        m = jnp.max(logits, axis=-1, keepdims=True)
        e = jnp.exp(logits - m)                                  # (tn, kk)
        denom = jnp.dot(e, s_ref[...], preferred_element_type=jnp.float32)   # (tn, k)
        inv = 1.0 / denom                                        # exact reciprocal
        scale = jnp.dot(inv, ew_ref[...], preferred_element_type=jnp.float32)  # (tn, kk)
        t = e * scale                                            # wk1[i] * softmax[n,i,j]
        # q[n,j] broadcast to every feature slot j*D+d, then fold over neighbours.
        q_exp = jnp.dot(t, gqe_ref[...], preferred_element_type=jnp.float32)   # (tn, Wp)
        prod = q_exp * r.astype(jnp.float32)
        pooled = jnp.dot(prod, f_ref[...], preferred_element_type=jnp.float32)  # (tn, D)
        o_ref[...] = (pooled + bk1_ref[0, 0]).astype(o_ref.dtype)

    out = pl.pallas_call(
        kernel,
        out_shape=jax.ShapeDtypeStruct((Np, D), out_dtype),
        grid_spec=pltpu.PrefetchScalarGridSpec(
            num_scalar_prefetch=0,
            grid=(grid_n,),
            in_specs=[
                pl.BlockSpec((tn, Wp), lambda i: (i, 0)),    # region_feats slab tile
                pl.BlockSpec((Wp, kk), lambda i: (0, 0)),    # block-diag convKK weight
                pl.BlockSpec((1, kk), lambda i: (0, 0)),     # convKK bias (flat)
                pl.BlockSpec((kk, k), lambda i: (0, 0)),     # group-sum matrix
                pl.BlockSpec((k, kk), lambda i: (0, 0)),     # group expand * wk1
                pl.BlockSpec((kk, Wp), lambda i: (0, 0)),    # q expand over feature slots
                pl.BlockSpec((Wp, D), lambda i: (0, 0)),     # neighbour fold
                pl.BlockSpec(memory_space=pltpu.MemorySpace.SMEM),  # bk1 scalar
            ],
            out_specs=pl.BlockSpec((tn, D), lambda i: (i, 0)),
        ),
        compiler_params=pltpu.CompilerParams(
            dimension_semantics=("parallel",),
            vmem_limit_bytes=vmem_limit),
    )(r2d, bd, bkk_flat, S, EW, GQE, F, bk1_s)

    return out[:N]


def vertex_conv_reference(r, wkk, bkk, wk1, bk1):
    mult = jnp.einsum("nid,ijd->nij", r, wkk) + bkk[None]
    p = jax.nn.softmax(mult, axis=-1)
    t = jnp.einsum("nij,njd->nid", p, r)
    return jnp.einsum("nid,i->nd", t, wk1[0]) + bk1[0, 0]


if __name__ == "__main__":
    # Small shapes consistent with the module: N regions, k neighbors, dim_in feats.
    # N is intentionally NOT a multiple of the tile (exercises cdiv + padding) and
    # k*dim_in == 128 (exercises the zero-waste flattened-width path).
    N, k, dim_in = 200, 4, 32

    key = jax.random.PRNGKey(0)
    k_x, k_wkk, k_bkk, k_wk1, k_bk1 = jax.random.split(key, 5)

    region_feats = jax.random.normal(k_x, (N, k, dim_in), dtype=jnp.float32)

    # Deterministic parameter init (PyTorch Conv1d-style uniform bounds).
    bound_kk = 1.0 / (dim_in ** 0.5)          # fan_in = (k/groups) * kernel_size = dim_in
    wkk = jax.random.uniform(k_wkk, (k, k, dim_in), jnp.float32, -bound_kk, bound_kk)
    bkk = jax.random.uniform(k_bkk, (k, k), jnp.float32, -bound_kk, bound_kk)
    bound_k1 = 1.0 / (k ** 0.5)               # fan_in = k * 1
    wk1 = jax.random.uniform(k_wk1, (1, k), jnp.float32, -bound_k1, bound_k1)
    bk1 = jax.random.uniform(k_bk1, (1, 1), jnp.float32, -bound_k1, bound_k1)

    out = vertex_conv(region_feats, wkk, bkk, wk1, bk1, tn=64)   # grid of 4 steps
    out = jax.block_until_ready(out)

    ref = vertex_conv_reference(region_feats, wkk, bkk, wk1, bk1)
    assert out.shape == (N, dim_in)
    assert jnp.allclose(out, ref, rtol=1e-4, atol=1e-4), "mismatch vs reference"

    print("KERNEL_OK")
</pallas_src>

<mosaic_0001>
module attributes {stable_mosaic.version = 11 : i64} {
  func.func @kernel(%arg0: i32, %arg1: memref<64x128xf32, #tpu.memory_space<vmem>>, %arg2: memref<128x16xf32, #tpu.memory_space<vmem>>, %arg3: memref<1x16xf32, #tpu.memory_space<vmem>>, %arg4: memref<16x4xf32, #tpu.memory_space<vmem>>, %arg5: memref<4x16xf32, #tpu.memory_space<vmem>>, %arg6: memref<16x128xf32, #tpu.memory_space<vmem>>, %arg7: memref<128x32xf32, #tpu.memory_space<vmem>>, %arg8: memref<1x1xf32, #tpu.memory_space<smem>>, %arg9: memref<64x32xf32, #tpu.memory_space<vmem>>) attributes {dimension_semantics = [#tpu.dimension_semantics<parallel>], iteration_bounds = array<i64: 4>, scalar_prefetch = 0 : i64, scratch_operands = 0 : i64, tpu.core_type = #tpu.core_type<tc>, window_params = [{transform_indices = @transform_0, window_bounds = array<i64: 64, 128>}, {pipeline_mode = #tpu.pipeline_mode<synchronous>, transform_indices = @transform_1, window_bounds = array<i64: 128, 16>}, {pipeline_mode = #tpu.pipeline_mode<synchronous>, transform_indices = @transform_2, window_bounds = array<i64: 1, 16>}, {pipeline_mode = #tpu.pipeline_mode<synchronous>, transform_indices = @transform_3, window_bounds = array<i64: 16, 4>}, {pipeline_mode = #tpu.pipeline_mode<synchronous>, transform_indices = @transform_4, window_bounds = array<i64: 4, 16>}, {pipeline_mode = #tpu.pipeline_mode<synchronous>, transform_indices = @transform_5, window_bounds = array<i64: 16, 128>}, {pipeline_mode = #tpu.pipeline_mode<synchronous>, transform_indices = @transform_6, window_bounds = array<i64: 128, 32>}, {transform_indices = @transform_7, window_bounds = array<i64: 1, 1>}, {transform_indices = @transform_8, window_bounds = array<i64: 64, 32>}]} {
    %c0 = arith.constant 0 : index
    %c0_0 = arith.constant 0 : index
    %0 = vector.load %arg1[%c0, %c0_0] : memref<64x128xf32, #tpu.memory_space<vmem>>, vector<64x128xf32>
    %c0_1 = arith.constant 0 : index
    %c0_2 = arith.constant 0 : index
    %1 = vector.load %arg2[%c0_1, %c0_2] : memref<128x16xf32, #tpu.memory_space<vmem>>, vector<128x16xf32>
    %cst = arith.constant dense<0.000000e+00> : vector<64x16xf32>
    %2 = tpu.matmul %0, %1, %cst {dimension_numbers = #tpu.dot_dimension_numbers<[1], [0], [0], [1], [0, 0, 1, 1], [], []>} : vector<64x128xf32>, vector<128x16xf32>, vector<64x16xf32> -> vector<64x16xf32>
    %c0_3 = arith.constant 0 : index
    %c0_4 = arith.constant 0 : index
    %3 = vector.load %arg3[%c0_3, %c0_4] : memref<1x16xf32, #tpu.memory_space<vmem>>, vector<1x16xf32>
    %4 = vector.broadcast %3 : vector<1x16xf32> to vector<64x16xf32>
    %5 = arith.addf %2, %4 : vector<64x16xf32>
    %cst_5 = arith.constant dense<0xFF800000> : vector<64xf32>
    %6 = vector.multi_reduction <maximumf>, %5, %cst_5 [1] : vector<64x16xf32> to vector<64xf32>
    %7 = vector.shape_cast %6 : vector<64xf32> to vector<64x1xf32>
    %8 = vector.broadcast %7 : vector<64x1xf32> to vector<64x16xf32>
    %9 = arith.subf %5, %8 : vector<64x16xf32>
    %10 = math.exp %9 : vector<64x16xf32>
    %c0_6 = arith.constant 0 : index
    %c0_7 = arith.constant 0 : index
    %11 = vector.load %arg4[%c0_6, %c0_7] : memref<16x4xf32, #tpu.memory_space<vmem>>, vector<16x4xf32>
    %cst_8 = arith.constant dense<0.000000e+00> : vector<64x4xf32>
    %12 = tpu.matmul %10, %11, %cst_8 {dimension_numbers = #tpu.dot_dimension_numbers<[1], [0], [0], [1], [0, 0, 1, 1], [], []>} : vector<64x16xf32>, vector<16x4xf32>, vector<64x4xf32> -> vector<64x4xf32>
    %cst_9 = arith.constant 1.000000e+00 : f32
    %13 = vector.broadcast %cst_9 : f32 to vector<64x4xf32>
    %14 = arith.divf %13, %12 : vector<64x4xf32>
    %c0_10 = arith.constant 0 : index
    %c0_11 = arith.constant 0 : index
    %15 = vector.load %arg5[%c0_10, %c0_11] : memref<4x16xf32, #tpu.memory_space<vmem>>, vector<4x16xf32>
    %cst_12 = arith.constant dense<0.000000e+00> : vector<64x16xf32>
    %16 = tpu.matmul %14, %15, %cst_12 {dimension_numbers = #tpu.dot_dimension_numbers<[1], [0], [0], [1], [0, 0, 1, 1], [], []>} : vector<64x4xf32>, vector<4x16xf32>, vector<64x16xf32> -> vector<64x16xf32>
    %17 = arith.mulf %10, %16 : vector<64x16xf32>
    %c0_13 = arith.constant 0 : index
    %c0_14 = arith.constant 0 : index
    %18 = vector.load %arg6[%c0_13, %c0_14] : memref<16x128xf32, #tpu.memory_space<vmem>>, vector<16x128xf32>
    %cst_15 = arith.constant dense<0.000000e+00> : vector<64x128xf32>
    %19 = tpu.matmul %17, %18, %cst_15 {dimension_numbers = #tpu.dot_dimension_numbers<[1], [0], [0], [1], [0, 0, 1, 1], [], []>} : vector<64x16xf32>, vector<16x128xf32>, vector<64x128xf32> -> vector<64x128xf32>
    %20 = arith.mulf %19, %0 : vector<64x128xf32>
    %c0_16 = arith.constant 0 : index
    %c0_17 = arith.constant 0 : index
    %21 = vector.load %arg7[%c0_16, %c0_17] : memref<128x32xf32, #tpu.memory_space<vmem>>, vector<128x32xf32>
    %cst_18 = arith.constant dense<0.000000e+00> : vector<64x32xf32>
    %22 = tpu.matmul %20, %21, %cst_18 {dimension_numbers = #tpu.dot_dimension_numbers<[1], [0], [0], [1], [0, 0, 1, 1], [], []>} : vector<64x128xf32>, vector<128x32xf32>, vector<64x32xf32> -> vector<64x32xf32>
    %c0_19 = arith.constant 0 : index
    %c0_20 = arith.constant 0 : index
    %23 = memref.load %arg8[%c0_19, %c0_20] : memref<1x1xf32, #tpu.memory_space<smem>>
    %24 = vector.broadcast %23 : f32 to vector<64x32xf32>
    %25 = arith.addf %22, %24 : vector<64x32xf32>
    %c0_21 = arith.constant 0 : index
    %c0_22 = arith.constant 0 : index
    %26 = vector.load %arg9[%c0_21, %c0_22] : memref<64x32xf32, #tpu.memory_space<vmem>>, vector<64x32xf32>
    tpu.vector_store %arg9[%c0_21, %c0_22], %25 {strides = array<i32>} : memref<64x32xf32, #tpu.memory_space<vmem>>, vector<64x32xf32>,
    return
  }
  func.func @transform_0(%arg0: i32) -> (i32, i32) {
    %c0_i32 = arith.constant 0 : i32
    %c0_i32_0 = arith.constant 0 : i32
    return %arg0, %c0_i32 : i32, i32
  }
  func.func @transform_1(%arg0: i32) -> (i32, i32) {
    %c0_i32 = arith.constant 0 : i32
    %c0_i32_0 = arith.constant 0 : i32
    %c0_i32_1 = arith.constant 0 : i32
    return %c0_i32, %c0_i32_0 : i32, i32
  }
  func.func @transform_2(%arg0: i32) -> (i32, i32) {
    %c0_i32 = arith.constant 0 : i32
    %c0_i32_0 = arith.constant 0 : i32
    %c0_i32_1 = arith.constant 0 : i32
    return %c0_i32, %c0_i32_0 : i32, i32
  }
  func.func @transform_3(%arg0: i32) -> (i32, i32) {
    %c0_i32 = arith.constant 0 : i32
    %c0_i32_0 = arith.constant 0 : i32
    %c0_i32_1 = arith.constant 0 : i32
    return %c0_i32, %c0_i32_0 : i32, i32
  }
  func.func @transform_4(%arg0: i32) -> (i32, i32) {
    %c0_i32 = arith.constant 0 : i32
    %c0_i32_0 = arith.constant 0 : i32
    %c0_i32_1 = arith.constant 0 : i32
    return %c0_i32, %c0_i32_0 : i32, i32
  }
  func.func @transform_5(%arg0: i32) -> (i32, i32) {
    %c0_i32 = arith.constant 0 : i32
    %c0_i32_0 = arith.constant 0 : i32
    %c0_i32_1 = arith.constant 0 : i32
    return %c0_i32, %c0_i32_0 : i32, i32
  }
  func.func @transform_6(%arg0: i32) -> (i32, i32) {
    %c0_i32 = arith.constant 0 : i32
    %c0_i32_0 = arith.constant 0 : i32
    %c0_i32_1 = arith.constant 0 : i32
    return %c0_i32, %c0_i32_0 : i32, i32
  }
  func.func @transform_7(%arg0: i32) -> (i32, i32) {
    %c0_i32 = arith.constant 0 : i32
    %c0_i32_0 = arith.constant 0 : i32
    %c0_i32_1 = arith.constant 0 : i32
    return %c0_i32, %c0_i32_0 : i32, i32
  }
  func.func @transform_8(%arg0: i32) -> (i32, i32) {
    %c0_i32 = arith.constant 0 : i32
    %c0_i32_0 = arith.constant 0 : i32
    return %arg0, %c0_i32 : i32, i32
  }
}

</mosaic_0001>

<bundles_post_ra>
// kernel: tpu_custom_call.1
= control target key start
LH: loop header
LB: loop body
LE: loop exit
PB: predicated region body
PF: predicated region fallthrough
CT: control target
= control target key end

     0   :  { %s1544_s29 = smov 0   ;;  %s1798_s0 = inlined_call_operand.vmem [shape: f32[256,128], index: 0, kind: input, shape index: {}]   ;;  %s1799_s1 = inlined_call_operand.vmem [shape: f32[128,16], index: 1, kind: input, shape index: {}]   ;;  %s1800_s2 = inlined_call_operand.vmem [shape: f32[1,16], index: 2, kind: input, shape index: {}]   ;;  %s1801_s3 = inlined_call_operand.vmem [shape: f32[16,4], index: 3, kind: input, shape index: {}]   ;;  %s1802_s4 = inlined_call_operand.vmem [shape: f32[4,16], index: 4, kind: input, shape index: {}]   ;;  %s1803_s5 = inlined_call_operand.vmem [shape: f32[16,128], index: 5, kind: input, shape index: {}]   ;;  %s1804_s6 = inlined_call_operand.vmem [shape: f32[128,32], index: 6, kind: input, shape index: {}]   ;;  %s1805_s7 = inlined_call_operand.<no memory space> [shape: f32[1,1], index: 7, kind: input, shape index: {}]   ;;  %s1806_s8 = inlined_call_operand.vmem [shape: f32[256,32], index: 8, kind: output, shape index: {}]  }
   0x1   :  { %13 = sst [smem:[#allocation2]] %s1805_s7 }
   0x2 LB: > { %s1112_s30 = sadd.s32 4294967295, %s1494_s29   ;;  %p1116_p0 = scmp.ge.s32.totalorder %s1494_s29, 1  ;;  %s1494_s29 = sphi %s1544_s29, %s19_s29  }
   0x3   : > { %p264_p1 = scmp.lt.s32.totalorder %s1494_s29, 5 }
   0x5   : > { %p265_p2 = pnand %p1116_p0, %p264_p1 }
   0x6   : > { %v318_v0 = vld [vmem:[%s1799_s1] sm:$0xff] (!%p265_p2)  ;;  %v319_v1 = vld [vmem:[%s1799_s1 + $0x8] sm:$0xff] (!%p265_p2)  ;;  %v320_v2 = vld [vmem:[%s1799_s1 + $0x10] sm:$0xff] (!%p265_p2)  ;;  %s1117_s14 = sshll.u32 (!%p265_p2), %s1112_s30, 3  ;;  %vm446_vm0 = vcmask (!%p265_p2), 130048   ;;  %vm668_vm1 = vcmask (!%p265_p2), 1043456  }
   0x7   : > { %268 = sbr.rel (%p265_p2) target bundleno = 1304 (0x518), region = 52  ;;  %v1360_v3 = vpack.c.bf16 (!%p265_p2), %v319_v1, %v318_v0  ;;  %v321_v4 = vld [vmem:[%s1799_s1 + $0x18] sm:$0xff] (!%p265_p2)  ;;  %p299_p3 = scmp.lt.s32.totalorder (!%p265_p2), %s1117_s14, 31  ;;  %v322_v6 = vld [vmem:[%s1799_s1 + $0x20] sm:$0xff] (!%p265_p2)  ;;  %v323_v7 = vld [vmem:[%s1799_s1 + $0x28] sm:$0xff] (!%p265_p2)  ;;  %vm643_vm2 = vcmask (!%p265_p2), 31744  }
   0x8   : > { %v1364_v5 = vpack.c.bf16 (!%p265_p2), %v321_v4, %v320_v2  ;;  %v1368_v8 = vpack.c.bf16 (!%p265_p2), %v323_v7, %v322_v6  ;;  %v324_v9 = vld [vmem:[%s1799_s1 + $0x30] sm:$0xff] (!%p265_p2)  ;;  %v325_v10 = vld [vmem:[%s1799_s1 + $0x38] sm:$0xff] (!%p265_p2)  ;;  %v326_v13 = vld [vmem:[%s1799_s1 + $0x40] sm:$0xff] (!%p265_p2)  ;;  %s940_s30 = sld [smem:[#allocation2]] (!%p265_p2)  ;;  %vm1047_vm3 = vcmask (!%p265_p2), 261120  }
   0x9   : > { %1361 = vmatprep.subr.bf16.mxu0 (!%p265_p2), %v1360_v3  ;;  %v1372_v12 = vpack.c.bf16 (!%p265_p2), %v325_v10, %v324_v9  ;;  %v327_v14 = vld [vmem:[%s1799_s1 + $0x48] sm:$0xff] (!%p265_p2)  ;;  %v328_v16 = vld [vmem:[%s1799_s1 + $0x50] sm:$0xff] (!%p265_p2)  ;;  %v329_v17 = vld [vmem:[%s1799_s1 + $0x58] sm:$0xff] (!%p265_p2) }
   0xa   : > { %1363 = vmatpush3.bf16.msra.mxu0 (!%p265_p2), %v1360_v3  ;;  %v1376_v15 = vpack.c.bf16 (!%p265_p2), %v327_v14, %v326_v13  ;;  %v1380_v18 = vpack.c.bf16 (!%p265_p2), %v329_v17, %v328_v16  ;;  %v330_v19 = vld [vmem:[%s1799_s1 + $0x60] sm:$0xff] (!%p265_p2)  ;;  %v331_v20 = vld [vmem:[%s1799_s1 + $0x68] sm:$0xff] (!%p265_p2)  ;;  %v332_v22 = vld [vmem:[%s1799_s1 + $0x70] sm:$0xff] (!%p265_p2) }
   0xb   : > { %1365 = vmatprep.subr.bf16.mxu0 (!%p265_p2), %v1364_v5  ;;  %v1384_v21 = vpack.c.bf16 (!%p265_p2), %v331_v20, %v330_v19  ;;  %v333_v23 = vld [vmem:[%s1799_s1 + $0x78] sm:$0xff] (!%p265_p2)  ;;  %v1121_v32 = vld [vmem:[%s1800_s2] ss:$0 sm:$0xff] (!%p265_p2)  ;;  %v496_v58 = vld [vmem:[%s1801_s3 + $0x8] sm:$0xff] (!%p265_p2) }
   0xc   : > { %v1388_v24 = vpack.c.bf16 (!%p265_p2), %v333_v23, %v332_v22  ;;  %v495_v57 = vld [vmem:[%s1801_s3] sm:$0xff] (!%p265_p2) }
   0xd   : > { %v1392_v59 = vpack.c.bf16 (!%p265_p2), %v496_v58, %v495_v57  ;;  %v642_v60 = vld [vmem:[%s1802_s4] sm:$0xf] (!%p265_p2)  ;;  %v925_v57 = vld [vmem:[%s1804_s6 + $0x8] sm:$0xff] (!%p265_p2)  ;;  %v926_v58 = vld [vmem:[%s1804_s6 + $0x10] sm:$0xff] (!%p265_p2) }
   0xe   : > { %s1808_s14 = smov (!%p299_p3, %s1117_s14), 31  ;;  %1367 = vmatpush3.bf16.msra.mxu0 %v1364_v5 }
   0xf   : > { %s1118_s21 = sshll.u32 %s1808_s14, 3  ;;  %1369 = vmatprep.subr.bf16.mxu0 %v1368_v8  ;;  %1393 = vmatprep.subr.bf16.mxu1 %v1392_v59 }
  0x10   : > { %s1584_s28 = scalar_lea.vmem %s1798_s0, %s1118_s21  ;;  %1395 = vmatpush3.bf16.msra.mxu1 %v1392_v59  ;;  %s308_s7 = scalar_lea.vmem %s1806_s8, %s1118_s21 }
  0x11   : > { %v1587_v11 = vld [vmem:[%s1584_s28] sm:$0xff]  ;;  %v1615_v25 = vld [vmem:[%s1584_s28 + $0x8] sm:$0xff]  ;;  %v1618_v26 = vld [vmem:[%s1584_s28 + $0x10] sm:$0xff]  ;;  %1286 = vmatprep.subr.msk.mxu1 %vm668_vm1, %v642_v60 }
  0x12   : > { %1258 = vmatprep.mubr.f32.mxu0 %v1587_v11  ;;  %1371 = vmatpush3.bf16.msra.mxu0 %v1368_v8  ;;  %v1623_v27 = vld [vmem:[%s1584_s28 + $0x18] sm:$0xff]  ;;  %v1626_v28 = vld [vmem:[%s1584_s28 + $0x20] sm:$0xff]  ;;  %v1631_v29 = vld [vmem:[%s1584_s28 + $0x28] sm:$0xff] }
  0x13   : > { %1373 = vmatprep.subr.bf16.mxu0 %v1372_v12  ;;  %v1634_v30 = vld [vmem:[%s1584_s28 + $0x30] sm:$0xff]  ;;  %v1639_v31 = vld [vmem:[%s1584_s28 + $0x38] sm:$0xff] }
  0x16   : > { %1375 = vmatpush3.bf16.msra.mxu0 %v1372_v12 }
  0x17   : > { %1377 = vmatprep.subr.bf16.mxu0 %v1376_v15 }
  0x1a   : > { %1379 = vmatpush3.bf16.msra.mxu0 %v1376_v15 }
  0x1b   : > { %1381 = vmatprep.subr.bf16.mxu0 %v1380_v18 }
  0x1e   : > { %1383 = vmatpush3.bf16.msra.mxu0 %v1380_v18 }
  0x1f   : > { %1385 = vmatprep.subr.bf16.mxu0 %v1384_v21 }
  0x22   : > { %1387 = vmatpush3.bf16.msra.mxu0 %v1384_v21 }
  0x23   : > { %1389 = vmatprep.subr.bf16.mxu0 %v1388_v24 }
  0x26   : > { %1391 = vmatpush3.bf16.msra.mxu0 %v1388_v24 }
  0x29   : > { %1259 = vmatmul.mubr.f32.vlgmr.msra.gmra.mrb[0].mxu0 %v1615_v25 }
  0x2a   : > { %1261 = vmatprep.mubr.f32.mxu0 %v1618_v26 }
  0x2d   : > { %1262 = vmatmul.mubr.f32.gmra.mrb[2].mxu0 %v1623_v27 }
  0x2e   : > { %1264 = vmatprep.mubr.f32.mxu0 %v1626_v28 }
  0x31   : > { %1265 = vmatmul.mubr.f32.gmra.mrb[4].mxu0 %v1631_v29 }
  0x32   : > { %1267 = vmatprep.mubr.f32.mxu0 %v1634_v30 }
  0x35   : > { %1268 = vmatmul.mubr.f32.gmra.mrb[6].mxu0 %v1639_v31 }
  0xfc   : > { %v1260_v33 = vpop.f32.mrb[0].mxu0 }
  0xfd   : > { %v407_v34 = vpop.f32.mrb[1].mxu0  ;;  %v413_v36 = vadd.f32 %v1260_v33, %v1121_v32 }
  0xfe   : > { %v408_v35 = vadd.f32 %v1121_v32, %v407_v34 }
  0xff   : > { %v450_v44 = vsel %vm446_vm0, %v413_v36, -inf }
 0x100   : > { %v1263_v37 = vpop.f32.mrb[2].mxu0  ;;  %v447_v38 = vsel %vm446_vm0, %v408_v35, -inf }
 0x101   : > { %v417_v39 = vpop.f32.mrb[3].mxu0  ;;  %448 = vmax.xlane.f32.xlu0 %v447_v38  ;;  %v423_v41 = vadd.f32 %v1263_v37, %v1121_v32  ;;  %v785_v37 = vld [vmem:[%s1803_s5] sm:$0xff]  ;;  %v786_v38 = vld [vmem:[%s1803_s5 + $0x8] sm:$0xff] }
 0x102   : > { %v418_v40 = vadd.f32 %v1121_v32, %v417_v39  ;;  %v1396_v39 = vpack.c.bf16 %v786_v38, %v785_v37 }
 0x103   : > { %v456_v49 = vsel %vm446_vm0, %v423_v41, -inf }
 0x104   : > { %v1266_v42 = vpop.f32.mrb[4].mxu0  ;;  %v453_v43 = vsel %vm446_vm0, %v418_v40, -inf }
 0x105   : > { %v427_v45 = vpop.f32.mrb[5].mxu0  ;;  %454 = vmax.xlane.f32.xlu1 %v453_v43  ;;  %451 = vmax.xlane.f32.xlu0 %v450_v44  ;;  %v433_v47 = vadd.f32 %v1266_v42, %v1121_v32 }
 0x106   : > { %v428_v46 = vadd.f32 %v1121_v32, %v427_v45 }
 0x107   : > { %v462_v54 = vsel %vm446_vm0, %v433_v47, -inf }
 0x108   : > { %v1269_v48 = vpop.f32.mrb[6].mxu0  ;;  %v459_v50 = vsel %vm446_vm0, %v428_v46, -inf }
 0x109   : > { %v437_v51 = vpop.f32.mrb[7].mxu0  ;;  %457 = vmax.xlane.f32.xlu1 %v456_v49  ;;  %460 = vmax.xlane.f32.xlu0 %v459_v50  ;;  %v443_v53 = vadd.f32 %v1269_v48, %v1121_v32 }
 0x10a   : > { %v438_v52 = vadd.f32 %v1121_v32, %v437_v51 }
 0x10b   : > { %v468_v56 = vsel %vm446_vm0, %v443_v53, -inf }
 0x10c   : > { %v465_v55 = vsel %vm446_vm0, %v438_v52, -inf }
 0x10d   : > { %463 = vmax.xlane.f32.xlu1 %v462_v54  ;;  %466 = vmax.xlane.f32.xlu0 %v465_v55 }
 0x111   : > { %469 = vmax.xlane.f32.xlu1 %v468_v56  ;;  %v924_v56 = vld [vmem:[%s1804_s6] sm:$0xff] }
 0x112   : > { %v1400_v59 = vpack.c.bf16 %v925_v57, %v924_v56 }
 0x114   : > { %1401 = vmatprep.subr.bf16.mxu0 %v1400_v59 }
 0x115   : > { %1403 = vmatpush3.bf16.msra.mxu0 %v1400_v59 }
 0x18e   : > { %v449_v61 = vpop.xlane.xlu0 %448 }
 0x18f   : > { %v471_v62 = vsub.f32 %v408_v35, %v449_v61 }
 0x191   : > { %v479_v63 = vmul.f32 1.442695, %v471_v62  ;;  %v928_v62 = vld [vmem:[%s1804_s6 + $0x20] sm:$0xff] }
 0x192   : > { %v455_v0 = vpop.xlane.xlu1 %454  ;;  %v452_v1 = vpop.xlane.xlu0 %451 }
 0x193   : > { %1456 = vpow2.f32 %v479_v63  ;;  %v473_v2 = vsub.f32 %v418_v40, %v455_v0  ;;  %v472_v3 = vsub.f32 %v413_v36, %v452_v1  ;;  %v929_v63 = vld [vmem:[%s1804_s6 + $0x28] sm:$0xff]  ;;  %v930_v1 = vld [vmem:[%s1804_s6 + $0x30] sm:$0xff] }
 0x194   : > { %v1408_v0 = vpack.c.bf16 %v929_v63, %v928_v62 }
 0x195   : > { %v483_v4 = vmul.f32 1.442695, %v473_v2  ;;  %v481_v5 = vmul.f32 1.442695, %v472_v3  ;;  %v931_v2 = vld [vmem:[%s1804_s6 + $0x38] sm:$0xff] }
 0x196   : > { %v458_v6 = vpop.xlane.xlu1 %457  ;;  %v461_v7 = vpop.xlane.xlu0 %460  ;;  %v1412_v3 = vpack.c.bf16 %v931_v2, %v930_v1 }
 0x197   : > { %1458 = vpow2.f32 %v483_v4  ;;  %v474_v8 = vsub.f32 %v423_v41, %v458_v6  ;;  %v475_v9 = vsub.f32 %v428_v46, %v461_v7  ;;  %v932_v4 = vld [vmem:[%s1804_s6 + $0x40] sm:$0xff]  ;;  %v934_v7 = vld [vmem:[%s1804_s6 + $0x50] sm:$0xff] }
 0x198   : > { %1460 = vpow2.f32 %v481_v5  ;;  %v933_v5 = vld [vmem:[%s1804_s6 + $0x48] sm:$0xff] }
 0x199   : > { %v485_v10 = vmul.f32 1.442695, %v474_v8  ;;  %v487_v12 = vmul.f32 1.442695, %v475_v9  ;;  %v1416_v6 = vpack.c.bf16 %v933_v5, %v932_v4  ;;  %v935_v8 = vld [vmem:[%s1804_s6 + $0x58] sm:$0xff] }
 0x19a   : > { %v464_v13 = vpop.xlane.xlu1 %463  ;;  %v467_v14 = vpop.xlane.xlu0 %466  ;;  %v1420_v9 = vpack.c.bf16 %v935_v8, %v934_v7 }
 0x19b   : > { %1462 = vpow2.f32 %v485_v10  ;;  %v476_v15 = vsub.f32 %v433_v47, %v464_v13  ;;  %v477_v16 = vsub.f32 %v438_v52, %v467_v14  ;;  %v936_v10 = vld [vmem:[%s1804_s6 + $0x60] sm:$0xff] }
 0x19c   : > { %1464 = vpow2.f32 %v487_v12  ;;  %v937_v12 = vld [vmem:[%s1804_s6 + $0x68] sm:$0xff] }
 0x19d   : > { %v1663_v17 = vpop.eup %1456  ;;  %v489_v18 = vmul.f32 1.442695, %v476_v15  ;;  %v491_v19 = vmul.f32 1.442695, %v477_v16  ;;  %v1424_v13 = vpack.c.bf16 %v937_v12, %v936_v10 }
 0x19e   : > { %v470_v20 = vpop.xlane.xlu1 %469  ;;  %1274 = vmatprep.mubr.msk.f32.mxu1 %vm446_vm0, %v1663_v17 }
 0x19f   : > { %1466 = vpow2.f32 %v489_v18  ;;  %v478_v21 = vsub.f32 %v443_v53, %v470_v20 }
 0x1a0   : > { %1468 = vpow2.f32 %v491_v19 }
 0x1a1   : > { %v1667_v22 = vpop.eup %1458  ;;  %v493_v23 = vmul.f32 1.442695, %v478_v21 }
 0x1a2   : > { %v1669_v24 = vpop.eup %1460 }
 0x1a3   : > { %1470 = vpow2.f32 %v493_v23  ;;  %1275 = vmatmul.mubr.msk.f32.vlgmr.msra.gmra.mrb[0].mxu1 %vm446_vm0, %v1669_v24 }
 0x1a4   : > { %1277 = vmatprep.mubr.msk.f32.mxu1 %vm446_vm0, %v1667_v22  ;;  %1287 = vmatpush3.msk.msra.mxu1 %vm668_vm1, %v642_v60  ;;  %v927_v60 = vld [vmem:[%s1804_s6 + $0x18] sm:$0xff] }
 0x1a5   : > { %v1676_v32 = vpop.eup %1462  ;;  %1397 = vmatprep.subr.bf16.mxu1 %v1396_v39  ;;  %v1404_v61 = vpack.c.bf16 %v927_v60, %v926_v58 }
 0x1a6   : > { %v1678_v33 = vpop.eup %1464 }
 0x1a7   : > { %1278 = vmatmul.mubr.msk.f32.gmra.mrb[2].mxu1 %vm446_vm0, %v1676_v32  ;;  %1405 = vmatprep.subr.bf16.mxu0 %v1404_v61 }
 0x1a8   : > { %1280 = vmatprep.mubr.msk.f32.mxu1 %vm446_vm0, %v1678_v33  ;;  %1407 = vmatpush3.bf16.msra.mxu0 %v1404_v61 }
 0x1a9   : > { %v1684_v34 = vpop.eup %1466  ;;  %1409 = vmatprep.subr.bf16.mxu0 %v1408_v0 }
 0x1aa   : > { %v1686_v35 = vpop.eup %1468 }
 0x1ab   : > { %1281 = vmatmul.mubr.msk.f32.gmra.mrb[4].mxu1 %vm446_vm0, %v1684_v34 }
 0x1ac   : > { %1283 = vmatprep.mubr.msk.f32.mxu1 %vm446_vm0, %v1686_v35  ;;  %1411 = vmatpush3.bf16.msra.mxu0 %v1408_v0 }
 0x1ad   : > { %v1692_v36 = vpop.eup %1470  ;;  %1413 = vmatprep.subr.bf16.mxu0 %v1412_v3 }
 0x1af   : > { %1284 = vmatmul.mubr.msk.f32.gmra.mrb[6].mxu1 %vm446_vm0, %v1692_v36 }
 0x1b0   : > { %1415 = vmatpush3.bf16.msra.mxu0 %v1412_v3 }
 0x1b1   : > { %1417 = vmatprep.subr.bf16.mxu0 %v1416_v6 }
 0x1b4   : > { %1419 = vmatpush3.bf16.msra.mxu0 %v1416_v6 }
 0x1b5   : > { %1421 = vmatprep.subr.bf16.mxu0 %v1420_v9 }
 0x1b8   : > { %1423 = vmatpush3.bf16.msra.mxu0 %v1420_v9 }
 0x1b9   : > { %1425 = vmatprep.subr.bf16.mxu0 %v1424_v13 }
 0x1bc   : > { %1427 = vmatpush3.bf16.msra.mxu0 %v1424_v13 }
 0x276   : > { %v1276_v40 = vpop.f32.mrb[0].mxu1 }
 0x277   : > { %v587_v41 = vpop.f32.mrb[1].mxu1 }
 0x278   : > { %1472 = vrcp.f32 %v587_v41 }
 0x279   : > { %1474 = vrcp.f32 %v1276_v40 }
 0x27a   : > { %v1279_v42 = vpop.f32.mrb[2].mxu1 }
 0x27b   : > { %v597_v43 = vpop.f32.mrb[3].mxu1 }
 0x27c   : > { %1476 = vrcp.f32 %v597_v43 }
 0x27d   : > { %1478 = vrcp.f32 %v1279_v42 }
 0x27e   : > { %v1282_v44 = vpop.f32.mrb[4].mxu1 }
 0x27f   : > { %v607_v45 = vpop.f32.mrb[5].mxu1 }
 0x280   : > { %1480 = vrcp.f32 %v607_v45 }
 0x281   : > { %1482 = vrcp.f32 %v1282_v44 }
 0x282   : > { %v1473_v46 = vpop.eup %1472  ;;  %v1285_v47 = vpop.f32.mrb[6].mxu1 }
 0x283   : > { %v1475_v48 = vpop.eup %1474  ;;  %v617_v49 = vpop.f32.mrb[7].mxu1  ;;  %1288 = vmatprep.mubr.msk.f32.mxu1 %vm643_vm2, %v1473_v46 }
 0x284   : > { %1484 = vrcp.f32 %v617_v49  ;;  %1289 = vmatmul.mubr.msk.f32.vlgmr.msra.gmra.mrb[8].mxu1 %vm643_vm2, %v1475_v48 }
 0x285   : > { %1486 = vrcp.f32 %v1285_v47  ;;  %1399 = vmatpush3.bf16.msra.mxu1 %v1396_v39 }
 0x286   : > { %v1477_v50 = vpop.eup %1476  ;;  %1432 = vmatprep.subr.bf16.mxu1 %v1400_v59 }
 0x287   : > { %v1479_v51 = vpop.eup %1478  ;;  %1291 = vmatprep.mubr.msk.f32.mxu1 %vm643_vm2, %v1477_v50 }
 0x288   : > { %1292 = vmatmul.mubr.msk.f32.gmra.mrb[10].mxu1 %vm643_vm2, %v1479_v51 }
 0x28a   : > { %v1481_v52 = vpop.eup %1480 }
 0x28b   : > { %v1483_v53 = vpop.eup %1482  ;;  %1294 = vmatprep.mubr.msk.f32.mxu1 %vm643_vm2, %v1481_v52 }
 0x28c   : > { %1295 = vmatmul.mubr.msk.f32.gmra.mrb[12].mxu1 %vm643_vm2, %v1483_v53 }
 0x28e   : > { %v1485_v54 = vpop.eup %1484 }
 0x28f   : > { %v1487_v55 = vpop.eup %1486  ;;  %1297 = vmatprep.mubr.msk.f32.mxu1 %vm643_vm2, %v1485_v54 }
 0x290   : > { %1298 = vmatmul.mubr.msk.f32.gmra.mrb[14].mxu1 %vm643_vm2, %v1487_v55 }
 0x357   : > { %v1290_v14 = vpop.f32.mrb[8].mxu1 }
 0x358   : > { %v738_v15 = vpop.f32.mrb[9].mxu1  ;;  %v778_v18 = vmul.f32 %v1669_v24, %v1290_v14 }
 0x359   : > { %v777_v16 = vmul.f32 %v1663_v17, %v738_v15 }
 0x35b   : > { %v1293_v19 = vpop.f32.mrb[10].mxu1  ;;  %1304 = vmatprep.mubr.msk.f32.mxu1 %vm446_vm0, %v777_v16 }
 0x35c   : > { %v748_v20 = vpop.f32.mrb[11].mxu1  ;;  %1305 = vmatmul.mubr.msk.f32.vlgmr.msra.gmra.mrb[16].mxu1 %vm446_vm0, %v778_v18  ;;  %v780_v23 = vmul.f32 %v1676_v32, %v1293_v19 }
 0x35d   : > { %v779_v21 = vmul.f32 %v1667_v22, %v748_v20  ;;  %1440 = vmatpush3.bf16.msra.mxu1 %v1400_v59 }
 0x35e   : > { %1433 = vmatprep.subr.bf16.mxu1 %v1404_v61 }
 0x35f   : > { %v1296_v37 = vpop.f32.mrb[12].mxu1  ;;  %1307 = vmatprep.mubr.msk.f32.mxu1 %vm446_vm0, %v779_v21 }
 0x360   : > { %v758_v38 = vpop.f32.mrb[13].mxu1  ;;  %1308 = vmatmul.mubr.msk.f32.gmra.mrb[18].mxu1 %vm446_vm0, %v780_v23  ;;  %v782_v24 = vmul.f32 %v1684_v34, %v1296_v37  ;;  %v939_v34 = vld [vmem:[%s1804_s6 + $0x78] sm:$0xff] }
 0x361   : > { %v781_v17 = vmul.f32 %v1678_v33, %v758_v38  ;;  %1441 = vmatpush3.bf16.msra.mxu1 %v1404_v61  ;;  %v938_v33 = vld [vmem:[%s1804_s6 + $0x70] sm:$0xff] }
 0x362   : > { %1434 = vmatprep.subr.bf16.mxu1 %v1408_v0 }
 0x363   : > { %v1299_v39 = vpop.f32.mrb[14].mxu1  ;;  %1310 = vmatprep.mubr.msk.f32.mxu1 %vm446_vm0, %v781_v17 }
 0x364   : > { %v768_v22 = vpop.f32.mrb[15].mxu1  ;;  %1311 = vmatmul.mubr.msk.f32.gmra.mrb[20].mxu1 %vm446_vm0, %v782_v24  ;;  %v784_v40 = vmul.f32 %v1692_v36, %v1299_v39 }
 0x365   : > { %v783_v32 = vmul.f32 %v1686_v35, %v768_v22  ;;  %1442 = vmatpush3.bf16.msra.mxu1 %v1408_v0  ;;  %v1428_v35 = vpack.c.bf16 %v939_v34, %v938_v33 }
 0x366   : > { %1435 = vmatprep.subr.bf16.mxu1 %v1412_v3 }
 0x367   : > { %1313 = vmatprep.mubr.msk.f32.mxu1 %vm446_vm0, %v783_v32  ;;  %1429 = vmatprep.subr.bf16.mxu0 %v1428_v35 }
 0x368   : > { %1314 = vmatmul.mubr.msk.f32.gmra.mrb[22].mxu1 %vm446_vm0, %v784_v40  ;;  %1431 = vmatpush3.bf16.msra.mxu0 %v1428_v35 }
 0x369   : > { %1443 = vmatpush3.bf16.msra.mxu1 %v1412_v3 }
 0x36a   : > { %1436 = vmatprep.subr.bf16.mxu1 %v1416_v6 }
 0x36d   : > { %1444 = vmatpush3.bf16.msra.mxu1 %v1416_v6 }
 0x36e   : > { %1437 = vmatprep.subr.bf16.mxu1 %v1420_v9 }
 0x371   : > { %1445 = vmatpush3.bf16.msra.mxu1 %v1420_v9 }
 0x372   : > { %1438 = vmatprep.subr.bf16.mxu1 %v1424_v13 }
 0x375   : > { %1446 = vmatpush3.bf16.msra.mxu1 %v1424_v13 }
 0x376   : > { %1439 = vmatprep.subr.bf16.mxu1 %v1428_v35 }
 0x379   : > { %1447 = vmatpush3.bf16.msra.mxu1 %v1428_v35 }
 0x42f   : > { %v1306_v36 = vpop.f32.mrb[16].mxu1 }
 0x430   : > { %v877_v41 = vpop.f32.mrb[17].mxu1  ;;  %v917_v43 = vmul.f32 %v1306_v36, %v1615_v25 }
 0x431   : > { %v916_v42 = vmul.f32 %v877_v41, %v1587_v11 }
 0x433   : > { %v1309_v44 = vpop.f32.mrb[18].mxu1  ;;  %1348 = vmatprep.mubr.f32.mxu0 %v916_v42 }
 0x434   : > { %v887_v45 = vpop.f32.mrb[19].mxu1  ;;  %1349 = vmatmul.mubr.f32.vlgmr.msra.gmra.mrb[8].mxu0 %v917_v43  ;;  %v919_v47 = vmul.f32 %v1309_v44, %v1623_v27 }
 0x435   : > { %v918_v46 = vmul.f32 %v887_v45, %v1618_v26  ;;  %v941_v26 = vstv %s940_s30 }
 0x437   : > { %v1312_v48 = vpop.f32.mrb[20].mxu1  ;;  %1351 = vmatprep.mubr.f32.mxu0 %v918_v46 }
 0x438   : > { %v897_v49 = vpop.f32.mrb[21].mxu1  ;;  %1352 = vmatmul.mubr.f32.gmra.mrb[10].mxu0 %v919_v47  ;;  %v921_v51 = vmul.f32 %v1312_v48, %v1631_v29 }
 0x439   : > { %v920_v50 = vmul.f32 %v897_v49, %v1626_v28 }
 0x43b   : > { %v1315_v11 = vpop.f32.mrb[22].mxu1  ;;  %1354 = vmatprep.mubr.f32.mxu0 %v920_v50 }
 0x43c   : > { %v907_v25 = vpop.f32.mrb[23].mxu1  ;;  %1355 = vmatmul.mubr.f32.gmra.mrb[12].mxu0 %v921_v51  ;;  %v923_v53 = vmul.f32 %v1315_v11, %v1639_v31 }
 0x43d   : > { %v922_v52 = vmul.f32 %v907_v25, %v1634_v30 }
 0x43f   : > { %1357 = vmatprep.mubr.f32.mxu1 %v922_v52 }
 0x440   : > { %1358 = vmatmul.mubr.f32.vlgmr.msra.gmra.mrb[24].mxu1 %v923_v53 }
 0x507   : > { %v1350_v27 = vpop.f32.mrb[8].mxu0 }
 0x508   : > { %v1014_v28 = vadd.f32 %v1350_v27, %v941_v26  ;;  %v1008_v29 = vpop.f32.mrb[9].mxu0 }
 0x509   : > { %v1009_v54 = vadd.f32 %v1008_v29, %v941_v26 }
 0x50a   : > { %1049 = vst.msk [vmem:[%s308_s7 + $0x8] sm:$0xff] %vm1047_vm3, %v1014_v28 }
 0x50b   : > { %1048 = vst.msk [vmem:[%s308_s7] sm:$0xff] %vm1047_vm3, %v1009_v54  ;;  %v1353_v30 = vpop.f32.mrb[10].mxu0 }
 0x50c   : > { %v1024_v31 = vadd.f32 %v1353_v30, %v941_v26  ;;  %v1018_v55 = vpop.f32.mrb[11].mxu0 }
 0x50d   : > { %v1019_v56 = vadd.f32 %v1018_v55, %v941_v26 }
 0x50e   : > { %1051 = vst.msk [vmem:[%s308_s7 + $0x18] sm:$0xff] %vm1047_vm3, %v1024_v31 }
 0x50f   : > { %1050 = vst.msk [vmem:[%s308_s7 + $0x10] sm:$0xff] %vm1047_vm3, %v1019_v56  ;;  %v1356_v57 = vpop.f32.mrb[12].mxu0 }
 0x510   : > { %v1034_v58 = vadd.f32 %v1356_v57, %v941_v26  ;;  %v1028_v59 = vpop.f32.mrb[13].mxu0 }
 0x511   : > { %v1029_v60 = vadd.f32 %v1028_v59, %v941_v26 }
 0x512   : > { %1053 = vst.msk [vmem:[%s308_s7 + $0x28] sm:$0xff] %vm1047_vm3, %v1034_v58 }
 0x513   : > { %1052 = vst.msk [vmem:[%s308_s7 + $0x20] sm:$0xff] %vm1047_vm3, %v1029_v60  ;;  %v1359_v61 = vpop.f32.mrb[24].mxu1 }
 0x514   : > { %v1044_v62 = vadd.f32 %v1359_v61, %v941_v26  ;;  %v1038_v63 = vpop.f32.mrb[25].mxu1 }
 0x515   : > { %v1039_v0 = vadd.f32 %v1038_v63, %v941_v26 }
 0x516   : > { %1055 = vst.msk [vmem:[%s308_s7 + $0x38] sm:$0xff] %vm1047_vm3, %v1044_v62 }
 0x517   : > { %1054 = vst.msk [vmem:[%s308_s7 + $0x30] sm:$0xff] %vm1047_vm3, %v1039_v0 }
 0x518 PF: > { %s19_s29 = sadd.s32 1, %s1494_s29  }
 0x519   : > { %p16_p4 = scmp.ge.s32.totalorder %s19_s29, 6  }
 0x51b   :  { %18 = sbr.rel (!%p16_p4) target bundleno = 2 (0x2), region = 82 }

</bundles_post_ra>
